<compile_context>
chip_gen: v6e
topology: v6e:2x2x1
jax: 0.10.0
libtpu: 0.0.40
codegen_flags: <defaults>
</compile_context>

<pallas_src>
import functools
import math

import jax
import jax.numpy as jnp
from jax.experimental import pallas as pl
from jax.experimental.pallas import tpu as pltpu


# ------------------------------ Pallas kernel --------------------------------

def _rnn_gate_kernel(lhs_ref, c0_ref, w_ref, ep_ref, out_ref, *, hidden_dim):
    """Fused LSTM cell step + Linear(H,1) + sigmoid + hard threshold.

    lhs:  (Bp, Kp)  bf16  -- [x | h0 | 1 | 0-pad] rows
    c0:   (Bp, H)   f32
    w:    (Kp, 4H)  bf16  -- [W_ih^T ; W_hh^T ; b_ih+b_hh ; 0-pad] rows
    ep:   (8, 128)  f32   -- row 0, lanes [0:H] = w_proj; row 1, lane 0 = b_proj
    out:  (Bp, 4H)  f32   -- [h1 | c1 | prob (bcast) | disc (bcast)]
    """
    H = hidden_dim

    # Single MXU pass: bf16 operands, f32 accumulation; bias folded in via the
    # ones-column / bias-row trick.
    gates = jnp.dot(lhs_ref[...], w_ref[...], preferred_element_type=jnp.float32)

    # Two full-width (Bp, 4H) EUP passes, then slice per gate (PyTorch order
    # i, f, g, o).
    sig = jax.nn.sigmoid(gates)
    th = jnp.tanh(gates)
    i = sig[:, 0 * H:1 * H]
    f = sig[:, 1 * H:2 * H]
    g = th[:, 2 * H:3 * H]
    o = sig[:, 3 * H:4 * H]

    c1 = f * c0_ref[...] + i * g
    h1 = o * jnp.tanh(c1)

    # Projection head Linear(H, 1): elementwise multiply + lane reduction.
    w_proj = ep_ref[0:1, 0:H]          # (1, H)
    b_proj = ep_ref[1:2, 0:1]          # (1, 1)
    proj = jnp.sum(h1 * w_proj, axis=-1, keepdims=True) + b_proj
    prob = jax.nn.sigmoid(proj)

    # Straight-through estimator: forward value is the hard threshold.
    disc = (prob > 0.5).astype(jnp.float32)

    # One lane-dense packed store: [h1 | c1 | prob | disc] -> (Bp, 4H).
    out_ref[...] = jnp.concatenate(
        [h1, c1,
         jnp.broadcast_to(prob, h1.shape),
         jnp.broadcast_to(disc, h1.shape)],
        axis=-1)


# -------------------------------- wrapper -------------------------------------

def _round_up(x, m):
    return (x + m - 1) // m * m


def prepare_params(params):
    """One-time (hoisted) weight packing: stacked bf16 RHS + f32 epilogue tile."""
    D = params['w_ih'].shape[1]
    H = params['w_hh'].shape[1]
    K = D + H + 1                       # [x | h0 | ones]
    Kp = _round_up(max(K, 128), 128)

    w_cat = jnp.zeros((Kp, 4 * H), jnp.float32)
    w_cat = w_cat.at[:D, :].set(params['w_ih'].T)
    w_cat = w_cat.at[D:D + H, :].set(params['w_hh'].T)
    w_cat = w_cat.at[D + H, :].set(params['b_ih'] + params['b_hh'])
    w_cat = w_cat.astype(jnp.bfloat16)

    ep = jnp.zeros((8, 128), jnp.float32)
    ep = ep.at[0, :H].set(params['w_proj'].reshape(H))
    ep = ep.at[1, 0].set(params['b_proj'].reshape(()))

    return dict(w_cat=w_cat, ep=ep)


def rnn_gate_forward(x, hidden, prep):
    """RNNGate.forward(x): returns (disc_prob (B,1,1,1), prob (B,1), new_hidden)."""
    w_cat, ep = prep['w_cat'], prep['ep']
    B = x.shape[0]
    x2 = x.reshape(B, -1).astype(jnp.float32)     # x.view(1, batch, -1), seq len 1
    H = w_cat.shape[1] // 4
    Kp = w_cat.shape[0]
    Bp = _round_up(max(B, 16), 16)                # native bf16 (16,128) tile rows

    h0 = hidden[0].reshape(B, H).astype(jnp.float32)
    c0 = hidden[1].reshape(B, H).astype(jnp.float32)

    # LHS rows: [x | h0 | 1], zero-padded to (Bp, Kp) and cast to bf16.
    lhs = jnp.concatenate([x2, h0, jnp.ones((B, 1), jnp.float32)], axis=-1)
    lhs = jnp.pad(lhs, ((0, Bp - B), (0, Kp - lhs.shape[1]))).astype(jnp.bfloat16)
    c0p = jnp.pad(c0, ((0, Bp - B), (0, 0)))

    vmem = pl.BlockSpec(memory_space=pltpu.MemorySpace.VMEM)
    out = pl.pallas_call(
        functools.partial(_rnn_gate_kernel, hidden_dim=H),
        out_shape=jax.ShapeDtypeStruct((Bp, 4 * H), jnp.float32),
        in_specs=[vmem, vmem, vmem, vmem],
        out_specs=vmem,
    )(lhs, c0p, w_cat, ep)

    h1 = out[:B, 0 * H:1 * H]
    c1 = out[:B, 1 * H:2 * H]
    prob = out[:B, 2 * H:2 * H + 1]
    disc = out[:B, 3 * H:3 * H + 1]

    disc_prob = disc.reshape(B, 1, 1, 1)
    new_hidden = (h1.reshape(1, B, H), c1.reshape(1, B, H))
    return disc_prob, prob, new_hidden


# ----------------------------- reference & init --------------------------------

def rnn_gate_reference(x, hidden, params):
    """Pure-JAX f32 reference (mirrors PyTorch nn.LSTM single step + proj + sigmoid)."""
    B = x.shape[0]
    H = params['w_hh'].shape[1]
    h0 = hidden[0].reshape(B, H)
    c0 = hidden[1].reshape(B, H)
    gates = (x.reshape(B, -1) @ params['w_ih'].T + h0 @ params['w_hh'].T
             + params['b_ih'] + params['b_hh'])
    i, f, g, o = jnp.split(gates, 4, axis=1)
    i, f, o = jax.nn.sigmoid(i), jax.nn.sigmoid(f), jax.nn.sigmoid(o)
    g = jnp.tanh(g)
    c1 = f * c0 + i * g
    h1 = o * jnp.tanh(c1)
    prob = jax.nn.sigmoid(h1 @ params['w_proj'].T + params['b_proj'])
    disc = (prob > 0.5).astype(jnp.float32).reshape(B, 1, 1, 1)
    return disc, prob, (h1.reshape(1, B, H), c1.reshape(1, B, H))


def init_hidden(batch_size, hidden_dim):
    """RNNGate.init_hidden: zero (h0, c0), each (1, B, H)."""
    z = jnp.zeros((1, batch_size, hidden_dim), jnp.float32)
    return (z, z)


def init_params(key, input_dim, hidden_dim):
    """PyTorch default init: LSTM and Linear weights ~ U(-1/sqrt(H), 1/sqrt(H))."""
    ks = jax.random.split(key, 6)
    bound = 1.0 / math.sqrt(hidden_dim)

    def u(k, shape):
        return jax.random.uniform(k, shape, jnp.float32, -bound, bound)

    return dict(
        w_ih=u(ks[0], (4 * hidden_dim, input_dim)),
        w_hh=u(ks[1], (4 * hidden_dim, hidden_dim)),
        b_ih=u(ks[2], (4 * hidden_dim,)),
        b_hh=u(ks[3], (4 * hidden_dim,)),
        w_proj=u(ks[4], (1, hidden_dim)),
        b_proj=u(ks[5], (1,)),
    )


# ---------------------------------- main ---------------------------------------

if __name__ == "__main__":
    key = jax.random.PRNGKey(0)
    kp, kx0, kx1 = jax.random.split(key, 3)

    B, D, H = 2, 64, 32        # batch=2, input_dim=64 (pooled+embedded), hidden_dim=32
    params = init_params(kp, D, H)
    prep = prepare_params(params)          # hoisted: weight stack/cast done once

    fwd = jax.jit(rnn_gate_forward)

    # Two consecutive gate invocations with recurrent hidden carry (as in SkipNet).
    hidden = init_hidden(B, H)
    hidden_ref = init_hidden(B, H)
    xs = [jax.random.normal(kx0, (B, D), jnp.float32),
          jax.random.normal(kx1, (B, D), jnp.float32)]

    for step, x in enumerate(xs):
        disc_prob, prob, hidden = fwd(x, hidden, prep)
        jax.block_until_ready(disc_prob)
        jax.block_until_ready(prob)
        jax.block_until_ready(hidden[0])
        jax.block_until_ready(hidden[1])

        disc_r, prob_r, hidden_ref = rnn_gate_reference(x, hidden_ref, params)

        assert disc_prob.shape == (B, 1, 1, 1)
        assert prob.shape == (B, 1)
        assert hidden[0].shape == (1, B, H) and hidden[1].shape == (1, B, H)
        # bf16 MXU operands vs f32 reference: generous tolerance.
        assert jnp.max(jnp.abs(prob - prob_r)) < 5e-2
        assert jnp.max(jnp.abs(hidden[0] - hidden_ref[0])) < 5e-2
        assert jnp.max(jnp.abs(hidden[1] - hidden_ref[1])) < 5e-2

    print("KERNEL_OK")
</pallas_src>

<mosaic_0001>
module attributes {stable_mosaic.version = 11 : i64} {
  func.func @_rnn_gate_kernel(%arg0: memref<16x128xbf16, #tpu.memory_space<vmem>>, %arg1: memref<16x32xf32, #tpu.memory_space<vmem>>, %arg2: memref<128x128xbf16, #tpu.memory_space<vmem>>, %arg3: memref<8x128xf32, #tpu.memory_space<vmem>>, %arg4: memref<16x128xf32, #tpu.memory_space<vmem>>) attributes {dimension_semantics = [], scalar_prefetch = 0 : i64, scratch_operands = 0 : i64, tpu.core_type = #tpu.core_type<tc>} {
    %c0 = arith.constant 0 : index
    %c0_0 = arith.constant 0 : index
    %0 = vector.load %arg0[%c0, %c0_0] : memref<16x128xbf16, #tpu.memory_space<vmem>>, vector<16x128xbf16>
    %c0_1 = arith.constant 0 : index
    %c0_2 = arith.constant 0 : index
    %1 = vector.load %arg2[%c0_1, %c0_2] : memref<128x128xbf16, #tpu.memory_space<vmem>>, vector<128x128xbf16>
    %cst = arith.constant dense<0.000000e+00> : vector<16x128xf32>
    %2 = tpu.matmul %0, %1, %cst {dimension_numbers = #tpu.dot_dimension_numbers<[1], [0], [0], [1], [0, 0, 1, 1], [], []>} : vector<16x128xbf16>, vector<128x128xbf16>, vector<16x128xf32> -> vector<16x128xf32>
    %3 = arith.negf %2 : vector<16x128xf32>
    %4 = math.exp %3 : vector<16x128xf32>
    %cst_3 = arith.constant 1.000000e+00 : f32
    %5 = vector.broadcast %cst_3 : f32 to vector<16x128xf32>
    %6 = arith.addf %5, %4 : vector<16x128xf32>
    %7 = arith.divf %5, %6 : vector<16x128xf32>
    %8 = math.tanh %2 : vector<16x128xf32>
    %9 = vector.extract_strided_slice %7 {offsets = [0, 0], sizes = [16, 32], strides = [1, 1]} : vector<16x128xf32> to vector<16x32xf32>
    %10 = vector.extract_strided_slice %7 {offsets = [0, 32], sizes = [16, 32], strides = [1, 1]} : vector<16x128xf32> to vector<16x32xf32>
    %11 = vector.extract_strided_slice %8 {offsets = [0, 64], sizes = [16, 32], strides = [1, 1]} : vector<16x128xf32> to vector<16x32xf32>
    %12 = vector.extract_strided_slice %7 {offsets = [0, 96], sizes = [16, 32], strides = [1, 1]} : vector<16x128xf32> to vector<16x32xf32>
    %c0_4 = arith.constant 0 : index
    %c0_5 = arith.constant 0 : index
    %13 = vector.load %arg1[%c0_4, %c0_5] : memref<16x32xf32, #tpu.memory_space<vmem>>, vector<16x32xf32>
    %14 = arith.mulf %10, %13 : vector<16x32xf32>
    %15 = arith.mulf %9, %11 : vector<16x32xf32>
    %16 = arith.addf %14, %15 : vector<16x32xf32>
    %17 = math.tanh %16 : vector<16x32xf32>
    %18 = arith.mulf %12, %17 : vector<16x32xf32>
    %c0_6 = arith.constant 0 : index
    %c0_7 = arith.constant 0 : index
    %19 = vector.load %arg3[%c0_6, %c0_7] : memref<8x128xf32, #tpu.memory_space<vmem>>, vector<1x32xf32>
    %c1 = arith.constant 1 : index
    %c0_8 = arith.constant 0 : index
    %20 = vector.load %arg3[%c1, %c0_8] : memref<8x128xf32, #tpu.memory_space<vmem>>, vector<1x1xf32>
    %21 = vector.broadcast %19 : vector<1x32xf32> to vector<16x32xf32>
    %22 = arith.mulf %18, %21 : vector<16x32xf32>
    %cst_9 = arith.constant dense<0.000000e+00> : vector<16xf32>
    %23 = vector.multi_reduction <add>, %22, %cst_9 [1] : vector<16x32xf32> to vector<16xf32>
    %24 = vector.shape_cast %23 : vector<16xf32> to vector<16x1xf32>
    %25 = vector.broadcast %20 : vector<1x1xf32> to vector<16x1xf32>
    %26 = arith.addf %24, %25 : vector<16x1xf32>
    %27 = arith.negf %26 : vector<16x1xf32>
    %28 = math.exp %27 : vector<16x1xf32>
    %cst_10 = arith.constant 1.000000e+00 : f32
    %29 = vector.broadcast %cst_10 : f32 to vector<16x1xf32>
    %30 = arith.addf %29, %28 : vector<16x1xf32>
    %31 = arith.divf %29, %30 : vector<16x1xf32>
    %cst_11 = arith.constant 5.000000e-01 : f32
    %32 = vector.broadcast %cst_11 : f32 to vector<16x1xf32>
    %33 = arith.cmpf ogt, %31, %32 : vector<16x1xf32>
    %34 = arith.extui %33 : vector<16x1xi1> to vector<16x1xi32>
    %35 = arith.sitofp %34 : vector<16x1xi32> to vector<16x1xf32>
    %36 = vector.shape_cast %31 : vector<16x1xf32> to vector<16x1xf32>
    %37 = vector.broadcast %36 : vector<16x1xf32> to vector<16x32xf32>
    %38 = vector.shape_cast %35 : vector<16x1xf32> to vector<16x1xf32>
    %39 = vector.broadcast %38 : vector<16x1xf32> to vector<16x32xf32>
    %40 = tpu.concatenate %18, %16, %37, %39 in 1 : vector<16x32xf32>, vector<16x32xf32>, vector<16x32xf32>, vector<16x32xf32> -> vector<16x128xf32>
    %c0_12 = arith.constant 0 : index
    %c0_13 = arith.constant 0 : index
    %41 = vector.load %arg4[%c0_12, %c0_13] : memref<16x128xf32, #tpu.memory_space<vmem>>, vector<16x128xf32>
    tpu.vector_store %arg4[%c0_12, %c0_13], %40 {strides = array<i32>} : memref<16x128xf32, #tpu.memory_space<vmem>>, vector<16x128xf32>,
    return
  }
}

</mosaic_0001>

<bundles_post_ra>
// kernel: rnn_gate_forward.1
= control target key start
LH: loop header
LB: loop body
LE: loop exit
PB: predicated region body
PF: predicated region fallthrough
CT: control target
= control target key end

     0   :  { %9 = vsyncpa [#allocation3], 0  ;;  %s413_s15 = smov [#allocation2]   ;;  %s507_s0 = inlined_call_operand.vmem [shape: bf16[16,128], index: 0, kind: input, shape index: {}]   ;;  %s508_s1 = inlined_call_operand.vmem [shape: f32[16,32], index: 1, kind: input, shape index: {}]   ;;  %s509_s2 = inlined_call_operand.hbm [shape: bf16[128,128], index: 2, kind: input, shape index: {}]   ;;  %s510_s3 = inlined_call_operand.vmem [shape: f32[8,128], index: 3, kind: input, shape index: {}]   ;;  %s511_s4 = inlined_call_operand.vmem [shape: f32[16,128], index: 4, kind: output, shape index: {}]  }
   0x1   :  { %s19_s16 = sshll.u32 %s413_s15, 4  ;;  %s20_s16 = int_to_ptr.vmem [resolvable:$true] %s19_s16 }
   0x2   :  { %s399_s17 = scalar_lea.vmem %s20_s16, 1024  ;;  %p404_p1 = scmp.lt.s32.totalorder %s20_s16, %s20_s16 }
   0x3   :  { %p400_p0 = scmp.ne.s32.totalorder %s20_s16, %s399_s17  ;;  %p405_p2 = scmp.lt.s32.totalorder %s399_s17, %s399_s17 }
   0x5   :  { %p406_p3 = por %p405_p2, %p404_p1 }
   0x7   :  { %p407_p4 = pnand %p406_p3, %p400_p0 }
   0x9   :  { %410 = shalt.err (!%p407_p4)
}
   0xa   :  { %s414_s18 = smov 64   ;;  %s415_s19 = smov 4  }
   0xb   :  { %25 = dma.hbm_to_vmem [thread:$0]  %s509_s2, 1024, %s20_s16, [#allocation3], %s414_s18, %s414_s18, %s415_s19  }
   0xc   :  { %411 = dma.done.wait [#allocation3], 1024  }
   0xd   :  { %412 = vsyncadd [#allocation3], 4294966272  ;;  %v416_v0 = vmov 0.0   ;;  %vm417_vm0 = vmmov 0   ;;  %v358_v1 = vld [vmem:[#allocation2 + $0x38] sm:$0xff]   ;;  %v359_v2 = vld [vmem:[#allocation2 + $0x30] sm:$0xff]  }
   0xe   :  { %323 = vmatprep.subr.bf16.mxu0 %v416_v0  ;;  %339 = vmatprep.mubr.msk.bf16.mxu0 %vm417_vm0, %v416_v0  ;;  %v360_v3 = vld [vmem:[#allocation2 + $0x28] sm:$0xff]   ;;  %v159_v4 = vld [vmem:[%s508_s1] sm:$0xff]  ;;  %s418_s2 = smov 32   ;;  %v362_v7 = vld [vmem:[#allocation2 + $0x18] sm:$0xff]   ;;  %s419_s28 = smov 96   ;;  %vm223_vm1 = vcmask 261120  }
   0xf   :  { %324 = vmatpush3.bf16.msra.mxu0 %v358_v1  ;;  %v361_v5 = vld [vmem:[#allocation2 + $0x20] sm:$0xff]   ;;  %163 = vrot.lane.b32.xlu1 %v159_v4, %s418_s2  ;;  %v160_v6 = vld [vmem:[%s508_s1 + $0x8] sm:$0xff]  ;;  %v363_v8 = vld [vmem:[#allocation2 + $0x10] sm:$0xff]   ;;  %v420_v52 = vmov 0   ;;  %vm284_vm4 = vcmask 523264   ;;  %vm287_vm5 = vcmask 785408  }
  0x10   :  { %325 = vmatprep.subr.bf16.mxu0 %v416_v0  ;;  %v364_v9 = vld [vmem:[#allocation2 + $0x8] sm:$0xff]   ;;  %v365_v10 = vld [vmem:[#allocation2] sm:$0xff]   ;;  %351 = vset.pattern.permute.xlu0 %v420_v52 }
  0x11   :  { %v366_v11 = vld [vmem:[%s507_s0] sm:$0xff]   ;;  %352 = vset.pattern.permute.xlu1 %v420_v52 }
  0x12   :  { %v308_v39 = vld [vmem:[%s510_s3] ss:$0 sm:$0xff]  ;;  %v309_v53 = vld [vmem:[%s510_s3 + $0x1] ss:$0 sm:$0xff] }
  0x13   :  { %326 = vmatpush3.bf16.msra.mxu0 %v359_v2  ;;  %165 = vrot.lane.b32.xlu1 %v160_v6, %s418_s2 }
  0x14   :  { %327 = vmatprep.subr.bf16.mxu0 %v416_v0 }
  0x17   :  { %328 = vmatpush3.bf16.msra.mxu0 %v360_v3 }
  0x18   :  { %329 = vmatprep.subr.bf16.mxu0 %v416_v0 }
  0x1b   :  { %330 = vmatpush3.bf16.msra.mxu0 %v361_v5 }
  0x1c   :  { %331 = vmatprep.subr.bf16.mxu0 %v416_v0 }
  0x1f   :  { %332 = vmatpush3.bf16.msra.mxu0 %v362_v7 }
  0x20   :  { %333 = vmatprep.subr.bf16.mxu0 %v416_v0 }
  0x23   :  { %334 = vmatpush3.bf16.msra.mxu0 %v363_v8 }
  0x24   :  { %335 = vmatprep.subr.bf16.mxu0 %v416_v0 }
  0x27   :  { %336 = vmatpush3.bf16.msra.mxu0 %v364_v9 }
  0x28   :  { %337 = vmatprep.subr.bf16.mxu0 %v416_v0 }
  0x2b   :  { %338 = vmatpush3.bf16.msra.mxu0 %v365_v10 }
  0x2e   :  { %340 = vmatmul.mubr.bf16.vlgmr.msra.gmra.mxu0 %v366_v11 }
  0x81   :  { %v164_v30 = vpop.permute.xlu1 %163 }
  0x85   :  { %v166_v32 = vpop.permute.xlu1 %165 }
  0xee   :  { %v138_v12 = vpop.f32.mrf.mxu0 }
  0xef   :  { %367 = vtanh.f32 %v138_v12  ;;  %v306_v18 = vmul.f32 -1.442695, %v138_v12 }
  0xf0   :  { %v341_v13 = vpop.f32.mrf.mxu0 }
  0xf2   :  { %v141_v14 = vpop.f32.mrf.mxu0 }
  0xf3   :  { %369 = vtanh.f32 %v141_v14  ;;  %v307_v19 = vmul.f32 -1.442695, %v141_v14 }
  0xf4   :  { %v342_v15 = vpop.f32.mrf.mxu0  ;;  %371 = vpow2.f32 %v306_v18 }
  0xf5   :  { %373 = vpow2.f32 %v307_v19 }
  0xfc   :  { %v368_v16 = vpop.eup %367 }
  0xfd   :  { %173 = vrot.lane.b32.xlu0 %v368_v16, %s414_s18 }
 0x100   :  { %v370_v17 = vpop.eup %369 }
 0x101   :  { %175 = vrot.lane.b32.xlu0 %v370_v17, %s414_s18  ;;  %v372_v20 = vpop.eup %371 }
 0x102   :  { %v151_v21 = vadd.f32 1.0, %v372_v20  ;;  %v374_v22 = vpop.eup %373 }
 0x103   :  { %v152_v23 = vadd.f32 1.0, %v374_v22 }
 0x104   :  { %375 = vrcp.f32 %v151_v21 }
 0x105   :  { %377 = vrcp.f32 %v152_v23 }
 0x111   :  { %v376_v24 = vpop.eup %375 }
 0x112   :  { %v378_v27 = vpop.eup %377  ;;  %v169_v31 = vmul.f32 %v376_v24, %v164_v30 }
 0x113   :  { %v170_v35 = vmul.f32 %v378_v27, %v166_v32 }
 0x16f   :  { %v174_v25 = vpop.permute.xlu0 %173 }
 0x170   :  { %v179_v26 = vmul.f32 %v376_v24, %v174_v25 }
 0x172   :  { %183 = vrot.lane.b32.xlu0 %v179_v26, %s418_s2 }
 0x173   :  { %v176_v28 = vpop.permute.xlu0 %175 }
 0x174   :  { %v180_v29 = vmul.f32 %v378_v27, %v176_v28 }
 0x176   :  { %185 = vrot.lane.b32.xlu1 %v180_v29, %s418_s2 }
 0x1e4   :  { %v184_v33 = vpop.permute.xlu0 %183 }
 0x1e5   :  { %v475_v34 = vadd.f32 %v184_v33, %v169_v31 }
 0x1e7   :  { %379 = vtanh.f32 %v475_v34 }
 0x1e8   :  { %v186_v36 = vpop.permute.xlu1 %185 }
 0x1e9   :  { %v478_v37 = vadd.f32 %v186_v36, %v170_v35 }
 0x1eb   :  { %381 = vtanh.f32 %v478_v37 }
 0x1f4   :  { %v380_v38 = vpop.eup %379 }
 0x1f5   :  { %195 = vrot.lane.b32.xlu0 %v380_v38, %s414_s18 }
 0x1f8   :  { %v382_v40 = vpop.eup %381 }
 0x1f9   :  { %210 = vrot.lane.b32.xlu0 %v308_v39, %s419_s28  ;;  %197 = vrot.lane.b32.xlu1 %v382_v40, %s414_s18 }
 0x267   :  { %v196_v41 = vpop.permute.xlu0 %195 }
 0x268   :  { %v201_v42 = vmul.f32 %v376_v24, %v196_v41 }
 0x26b   :  { %v211_v43 = vpop.permute.xlu0 %210  ;;  %v198_v44 = vpop.permute.xlu1 %197 }
 0x26c   :  { %v213_v45 = vmul.f32 %v211_v43, %v201_v42  ;;  %v202_v46 = vmul.f32 %v378_v27, %v198_v44 }
 0x26e   :  { %v214_v47 = vmul.f32 %v211_v43, %v202_v46  ;;  %217 = vrot.lane.b32.xlu1 %v213_v45, %s418_s2 }
 0x270   :  { %219 = vrot.lane.b32.xlu0 %v214_v47, %s418_s2 }
 0x2e0   :  { %v218_v48 = vpop.permute.xlu1 %217 }
 0x2e1   :  { %v224_v49 = vsel %vm223_vm1, %v218_v48, 0.0 }
 0x2e2   :  { %v220_v50 = vpop.permute.xlu0 %219  ;;  %225 = vadd.xlane.f32.xlu1 %v224_v49 }
 0x2e3   :  { %v227_v51 = vsel %vm223_vm1, %v220_v50, 0.0 }
 0x2e4   :  { %228 = vadd.xlane.f32.xlu0 %v227_v51 }
 0x2f3   :  { %276 = vrot.lane.b32.xlu1 %v201_v42, %s418_s2 }
 0x36b   :  { %v226_v54 = vpop.xlane.xlu1 %225 }
 0x36c   :  { %v234_v55 = vadd.f32 %v309_v53, %v226_v54 }
 0x36d   :  { %v229_v56 = vpop.xlane.xlu0 %228 }
 0x36e   :  { %v310_v57 = vmul.f32 -1.442695, %v234_v55  ;;  %v235_v58 = vadd.f32 %v309_v53, %v229_v56 }
 0x36f   :  { %v277_v6 = vpop.permute.xlu1 %276 }
 0x370   :  { %383 = vpow2.f32 %v310_v57  ;;  %v311_v59 = vmul.f32 -1.442695, %v235_v58  ;;  %v282_v10 = vsel %vm223_vm1, %v277_v6, %v475_v34 }
 0x372   :  { %385 = vpow2.f32 %v311_v59 }
 0x37d   :  { %v384_v60 = vpop.eup %383 }
 0x37e   :  { %v242_v61 = vadd.f32 1.0, %v384_v60 }
 0x37f   :  { %v386_v62 = vpop.eup %385 }
 0x380   :  { %387 = vrcp.f32 %v242_v61  ;;  %v243_v63 = vadd.f32 1.0, %v386_v62 }
 0x382   :  { %389 = vrcp.f32 %v243_v63 }
 0x38d   :  { %v388_v1 = vpop.eup %387 }
 0x38e   :  { %256 = vperm.xlu0 %351, %v388_v1   ;;  %vm248_vm2 = vcmp.gt.f32.partialorder %v388_v1, 0.5 }
 0x38f   :  { %v390_v2 = vpop.eup %389  ;;  %v312_v3 = vsel %vm248_vm2, 1.0, %v416_v0 }
 0x390   :  { %261 = vperm.xlu1 %352, %v390_v2   ;;  %vm249_vm3 = vcmp.gt.f32.partialorder %v390_v2, 0.5 }
 0x391   :  { %v313_v4 = vsel %vm249_vm3, 1.0, %v416_v0 }
 0x392   :  { %v353_v5 = vpack.i.bf16 %v313_v4, %v312_v3 }
 0x394   :  { %354 = vperm.xlu1 %352, %v353_v5  }
 0x398   :  { %278 = vrot.lane.b32.xlu1 %v202_v46, %s418_s2 }
 0x409   :  { %v257_v8 = vpop.permute.xlu0 %256 }
 0x40a   :  { %v285_v12 = vsel %vm284_vm4, %v282_v10, %v257_v8 }
 0x40b   :  { %v262_v7 = vpop.permute.xlu1 %261 }
 0x40f   :  { %v355_v9 = vpop.permute.xlu1 %354 }
 0x410   :  { %v356_v11 = vunpack.i.l.bf16 %v355_v9  ;;  %v357_v14 = vunpack.i.h.bf16 %v355_v9 }
 0x412   :  { %v288_v13 = vsel %vm287_vm5, %v285_v12, %v356_v11 }
 0x413   :  { %290 = vst [vmem:[%s511_s4] sm:$0xff] %v288_v13  ;;  %v279_v0 = vpop.permute.xlu1 %278 }
 0x414   :  { %v283_v15 = vsel %vm223_vm1, %v279_v0, %v478_v37 }
 0x415   :  { %v286_v16 = vsel %vm284_vm4, %v283_v15, %v262_v7 }
 0x416   :  { %v289_v17 = vsel %vm287_vm5, %v286_v16, %v357_v14 }
 0x417   :  { %291 = vst [vmem:[%s511_s4 + $0x8] sm:$0xff] %v289_v17 }
 0x418   :  { %296 = vsyncpa [#allocation3], 1 }

</bundles_post_ra>
